<compile_context>
chip_gen: v7x
topology: tpu7x:2x2x1
jax: 0.10.0
libtpu: 0.0.40
codegen_flags: <defaults>
</compile_context>

<pallas_src>
import functools

import jax
import jax.numpy as jnp
from jax.experimental import pallas as pl
from jax.experimental.pallas import tpu as pltpu


def _layernorm_kernel(x_ref, w_ref, b_ref, o_ref, *, eps, hidden):
    # x_ref: (BLOCK_ROWS, hidden)   w_ref/b_ref: (1, hidden) f32
    x = x_ref[...].astype(jnp.float32)

    # Fused single-pass statistics: one traversal computes sum(x) and sum(x*x),
    # accumulated in f32. var = E[x^2] - E[x]^2 (population variance, matching
    # torch.var(unbiased=False)); clamp at 0 to guard against tiny negative
    # round-off.
    inv_h = jnp.float32(1.0 / hidden)
    s = jnp.sum(x, axis=-1, keepdims=True)
    sq = jnp.sum(x * x, axis=-1, keepdims=True)
    mean = s * inv_h
    var = jnp.maximum(sq * inv_h - mean * mean, 0.0)

    inv = jax.lax.rsqrt(var + jnp.float32(eps))
    out = (x - mean) * inv * w_ref[...] + b_ref[...]
    o_ref[...] = out.astype(o_ref.dtype)


def _choose_block_rows(rows, hidden, dtype):
    """Pick a sublane-aligned row-tile sized to ~4 MiB per block."""
    itemsize = jnp.dtype(dtype).itemsize
    target_block_bytes = 4 * 1024 * 1024
    br = target_block_bytes // max(1, hidden * itemsize)
    br = max(8, min(br, 1024))
    # Sublane pack: 8 rows for 32-bit dtypes, 16 for 16-bit (bf16) dtypes.
    align = 16 if itemsize < 4 else 8
    br = max(align, (br // align) * align)
    if rows <= br:
        # Full extent is always a legal block shape (and avoids padding).
        return rows
    return br


def layer_norm(inputs, weight, bias, eps=1e-05):
    """LayerNorm over the last dimension, matching the PyTorch module."""
    hidden = inputs.shape[-1]
    assert weight.shape == (hidden,) and bias.shape == (hidden,)
    orig_shape = inputs.shape

    x2d = inputs.reshape(-1, hidden)
    rows = x2d.shape[0]

    # Cast params to f32 once in the wrapper (not per grid step inside the kernel).
    w2d = weight.astype(jnp.float32).reshape(1, hidden)
    b2d = bias.astype(jnp.float32).reshape(1, hidden)

    # TODO(synk): for hidden < 128 (non-lane-dense), repack rows into the lane
    # axis with segmented reductions; current layout underutilizes lanes there.

    block_rows = _choose_block_rows(rows, hidden, inputs.dtype)
    grid = (pl.cdiv(rows, block_rows),)

    itemsize = jnp.dtype(inputs.dtype).itemsize
    cost = pl.CostEstimate(
        flops=8 * rows * hidden,
        transcendentals=rows,
        bytes_accessed=2 * rows * hidden * itemsize + 2 * hidden * 4,
    )

    kernel = functools.partial(_layernorm_kernel, eps=eps, hidden=hidden)

    out = pl.pallas_call(
        kernel,
        out_shape=jax.ShapeDtypeStruct((rows, hidden), inputs.dtype),
        grid_spec=pltpu.PrefetchScalarGridSpec(
            num_scalar_prefetch=0,
            grid=grid,
            in_specs=[
                pl.BlockSpec((block_rows, hidden), lambda i: (i, 0)),
                pl.BlockSpec((1, hidden), lambda i: (0, 0)),
                pl.BlockSpec((1, hidden), lambda i: (0, 0)),
            ],
            out_specs=pl.BlockSpec((block_rows, hidden), lambda i: (i, 0)),
        ),
        compiler_params=pltpu.CompilerParams(
            # Row blocks are independent -> shard across both TCs on v7x.
            dimension_semantics=("parallel",),
            # Headroom for larger tiles; stays under v7x's 64 MiB physical VMEM.
            vmem_limit_bytes=48 * 1024 * 1024,
        ),
        cost_estimate=cost,
    )(x2d, w2d, b2d)
    return out.reshape(orig_shape)


if __name__ == "__main__":
    key = jax.random.PRNGKey(0)
    batch, seq, hidden = 2, 8, 32

    # Deterministic parameter init matching reset_parameters():
    # weight = ones, bias = zeros.
    weight = jnp.ones((hidden,), dtype=jnp.float32)
    bias = jnp.zeros((hidden,), dtype=jnp.float32)

    x = jax.random.normal(key, (batch, seq, hidden), dtype=jnp.float32)

    out = layer_norm(x, weight, bias, eps=1e-05)
    out = jax.block_until_ready(out)

    # Pure-JAX reference check (two-pass, same as PyTorch semantics).
    mean = jnp.mean(x, axis=-1, keepdims=True)
    var = jnp.mean((x - mean) ** 2, axis=-1, keepdims=True)
    ref = (x - mean) / jnp.sqrt(var + 1e-05) * weight + bias
    assert out.shape == x.shape
    assert jnp.allclose(out, ref, atol=1e-5, rtol=1e-5), "mismatch vs reference"

    print("KERNEL_OK")
</pallas_src>

<mosaic_0001>
module attributes {stable_mosaic.version = 11 : i64} {
  func.func @_layernorm_kernel(%arg0: i32, %arg1: memref<16x32xf32, #tpu.memory_space<vmem>>, %arg2: memref<1x32xf32, #tpu.memory_space<vmem>>, %arg3: memref<1x32xf32, #tpu.memory_space<vmem>>, %arg4: memref<16x32xf32, #tpu.memory_space<vmem>>) attributes {dimension_semantics = [#tpu.dimension_semantics<parallel>], iteration_bounds = array<i64: 1>, scalar_prefetch = 0 : i64, scratch_operands = 0 : i64, tpu.core_type = #tpu.core_type<tc>, window_params = [{transform_indices = @transform_0, window_bounds = array<i64: 16, 32>}, {pipeline_mode = #tpu.pipeline_mode<synchronous>, transform_indices = @transform_1, window_bounds = array<i64: 1, 32>}, {pipeline_mode = #tpu.pipeline_mode<synchronous>, transform_indices = @transform_2, window_bounds = array<i64: 1, 32>}, {transform_indices = @transform_3, window_bounds = array<i64: 16, 32>}]} {
    %c0 = arith.constant 0 : index
    %c0_0 = arith.constant 0 : index
    %0 = vector.load %arg1[%c0, %c0_0] : memref<16x32xf32, #tpu.memory_space<vmem>>, vector<16x32xf32>
    %cst = arith.constant dense<0.000000e+00> : vector<16xf32>
    %1 = vector.multi_reduction <add>, %0, %cst [1] : vector<16x32xf32> to vector<16xf32>
    %2 = vector.shape_cast %1 : vector<16xf32> to vector<16x1xf32>
    %3 = arith.mulf %0, %0 : vector<16x32xf32>
    %cst_1 = arith.constant dense<0.000000e+00> : vector<16xf32>
    %4 = vector.multi_reduction <add>, %3, %cst_1 [1] : vector<16x32xf32> to vector<16xf32>
    %5 = vector.shape_cast %4 : vector<16xf32> to vector<16x1xf32>
    %cst_2 = arith.constant 3.125000e-02 : f32
    %6 = vector.broadcast %cst_2 : f32 to vector<16x1xf32>
    %7 = arith.mulf %2, %6 : vector<16x1xf32>
    %cst_3 = arith.constant 3.125000e-02 : f32
    %8 = vector.broadcast %cst_3 : f32 to vector<16x1xf32>
    %9 = arith.mulf %5, %8 : vector<16x1xf32>
    %10 = arith.mulf %7, %7 : vector<16x1xf32>
    %11 = arith.subf %9, %10 : vector<16x1xf32>
    %cst_4 = arith.constant 0.000000e+00 : f32
    %12 = vector.broadcast %cst_4 : f32 to vector<16x1xf32>
    %13 = arith.maximumf %11, %12 : vector<16x1xf32>
    %cst_5 = arith.constant 9.99999974E-6 : f32
    %14 = vector.broadcast %cst_5 : f32 to vector<16x1xf32>
    %15 = arith.addf %13, %14 : vector<16x1xf32>
    %16 = math.rsqrt %15 : vector<16x1xf32>
    %17 = vector.broadcast %7 : vector<16x1xf32> to vector<16x32xf32>
    %18 = arith.subf %0, %17 : vector<16x32xf32>
    %19 = vector.broadcast %16 : vector<16x1xf32> to vector<16x32xf32>
    %20 = arith.mulf %18, %19 : vector<16x32xf32>
    %c0_6 = arith.constant 0 : index
    %c0_7 = arith.constant 0 : index
    %21 = vector.load %arg2[%c0_6, %c0_7] : memref<1x32xf32, #tpu.memory_space<vmem>>, vector<1x32xf32>
    %22 = vector.broadcast %21 : vector<1x32xf32> to vector<16x32xf32>
    %23 = arith.mulf %20, %22 : vector<16x32xf32>
    %c0_8 = arith.constant 0 : index
    %c0_9 = arith.constant 0 : index
    %24 = vector.load %arg3[%c0_8, %c0_9] : memref<1x32xf32, #tpu.memory_space<vmem>>, vector<1x32xf32>
    %25 = vector.broadcast %24 : vector<1x32xf32> to vector<16x32xf32>
    %26 = arith.addf %23, %25 : vector<16x32xf32>
    %c0_10 = arith.constant 0 : index
    %c0_11 = arith.constant 0 : index
    %27 = vector.load %arg4[%c0_10, %c0_11] : memref<16x32xf32, #tpu.memory_space<vmem>>, vector<16x32xf32>
    tpu.vector_store %arg4[%c0_10, %c0_11], %26 {strides = array<i32>} : memref<16x32xf32, #tpu.memory_space<vmem>>, vector<16x32xf32>,
    return
  }
  func.func @transform_0(%arg0: i32) -> (i32, i32) {
    %c0_i32 = arith.constant 0 : i32
    %c0_i32_0 = arith.constant 0 : i32
    return %arg0, %c0_i32 : i32, i32
  }
  func.func @transform_1(%arg0: i32) -> (i32, i32) {
    %c0_i32 = arith.constant 0 : i32
    %c0_i32_0 = arith.constant 0 : i32
    %c0_i32_1 = arith.constant 0 : i32
    return %c0_i32, %c0_i32_0 : i32, i32
  }
  func.func @transform_2(%arg0: i32) -> (i32, i32) {
    %c0_i32 = arith.constant 0 : i32
    %c0_i32_0 = arith.constant 0 : i32
    %c0_i32_1 = arith.constant 0 : i32
    return %c0_i32, %c0_i32_0 : i32, i32
  }
  func.func @transform_3(%arg0: i32) -> (i32, i32) {
    %c0_i32 = arith.constant 0 : i32
    %c0_i32_0 = arith.constant 0 : i32
    return %arg0, %c0_i32 : i32, i32
  }
}

</mosaic_0001>

<bundles_post_ra>
// kernel: tpu_custom_call.1
= control target key start
LH: loop header
LB: loop body
LE: loop exit
PB: predicated region body
PF: predicated region fallthrough
CT: control target
= control target key end

     0   :  { %8 = vsyncpa [#allocation3], 0  ;;  %s225_s0 = inlined_call_operand.hbm [shape: f32[16,32], index: 0, kind: input, shape index: {}]   ;;  %s226_s1 = inlined_call_operand.vmem [shape: f32[1,32], index: 1, kind: input, shape index: {}]   ;;  %s227_s2 = inlined_call_operand.vmem [shape: f32[1,32], index: 2, kind: input, shape index: {}]   ;;  %s228_s3 = inlined_call_operand.hbm [shape: f32[16,32], index: 3, kind: output, shape index: {}]  }
   0x1   :  { %9 = vsyncpa [#allocation4], 0  ;;  %s159_s12 = smov [#allocation2]   ;;  %s111_s16 = scalar_lea.hbm %s225_s0, 256 }
   0x2   :  { %s15_s13 = sshll.u32 %s159_s12, 4  ;;  %p112_p0 = scmp.ne.s32.totalorder %s225_s0, %s111_s16  ;;  %s16_s13 = int_to_ptr.vmem [resolvable:$true] %s15_s13 }
   0x3   :  { %p115_p1 = scmp.lt.u32.totalorder %s111_s16, %s225_s0 }
   0x5   :  { %p117_p2 = pnand %p115_p1, %p112_p0 }
   0x7   :  { %120 = shalt.err (!%p117_p2)
}
   0x8   :  { %s121_s21 = scalar_lea.vmem %s16_s13, 256  ;;  %p126_p4 = scmp.lt.s32.totalorder %s16_s13, %s16_s13 }
   0x9   :  { %p122_p3 = scmp.ne.s32.totalorder %s16_s13, %s121_s21  ;;  %p127_p5 = scmp.lt.s32.totalorder %s121_s21, %s121_s21 }
   0xb   :  { %p128_p6 = por %p127_p5, %p126_p4 }
   0xd   :  { %p129_p7 = pnand %p128_p6, %p122_p3 }
   0xf   :  { %132 = shalt.err (!%p129_p7)
}
  0x10   :  { %s160_s22 = smov 128   ;;  %s161_s23 = smov 8  }
  0x11   :  { %21 = dma.hbm_to_vmem [thread:$0]  %s225_s0, 256, %s16_s13, [#allocation3], %s160_s22, %s160_s22, %s161_s23  }
  0x12   :  { %155 = dma.done.wait [#allocation3], 256  }
  0x13   :  { %156 = vsyncadd [#allocation3], 4294967040  ;;  %vm31_vm0 = vcmask 261120   ;;  %v29_v0 = vld [vmem:[#allocation2] sm:$0xff]  ;;  %v30_v1 = vld [vmem:[#allocation2 + $0x8] sm:$0xff]  ;;  %s162_s29 = smov [#allocation5]  }
  0x14   :  { %v32_v2 = vsel %vm31_vm0, %v29_v0, 0.0  ;;  %v38_v3 = vmul.f32 %v29_v0, %v29_v0  ;;  %v39_v4 = vmul.f32 %v30_v1, %v30_v1  ;;  %v35_v6 = vsel %vm31_vm0, %v30_v1, 0.0  ;;  %v101_v26 = vld [vmem:[%s226_s1] ss:$0 sm:$0xff]  ;;  %s89_s30 = sshll.u32 %s162_s29, 4  ;;  %s90_s30 = int_to_ptr.vmem [resolvable:$true] %s89_s30 }
  0x15   :  { %33 = vadd.xlane.f32.xlu0 %v32_v2  ;;  %v102_v28 = vld [vmem:[%s227_s2] ss:$0 sm:$0xff]  ;;  %s133_s1 = scalar_lea.vmem %s90_s30, 256  ;;  %p138_p9 = scmp.lt.s32.totalorder %s90_s30, %s90_s30 }
  0x16   :  { %v40_v5 = vsel %vm31_vm0, %v38_v3, 0.0  ;;  %v43_v7 = vsel %vm31_vm0, %v39_v4, 0.0  ;;  %p134_p8 = scmp.ne.s32.totalorder %s90_s30, %s133_s1  ;;  %p139_p10 = scmp.lt.s32.totalorder %s133_s1, %s133_s1 }
  0x17   :  { %41 = vadd.xlane.f32.xlu1 %v40_v5 }
  0x18   :  { %p140_p11 = por %p139_p10, %p138_p9 }
  0x19   :  { %36 = vadd.xlane.f32.xlu0 %v35_v6 }
  0x1a   :  { %p141_p12 = pnand %p140_p11, %p134_p8 }
  0x1b   :  { %44 = vadd.xlane.f32.xlu1 %v43_v7 }
  0xa2   :  { %v34_v8 = vpop.xlane.xlu0 %33 }
  0xa3   :  { %v46_v9 = vmul.f32 0.03125, %v34_v8 }
  0xa4   :  { %v42_v10 = vpop.xlane.xlu1 %41 }
  0xa5   :  { %v50_v11 = vmul.f32 %v46_v9, %v46_v9  ;;  %v48_v12 = vmul.f32 0.03125, %v42_v10  ;;  %v60_v24 = vsub.f32 %v29_v0, %v46_v9 }
  0xa6   :  { %v37_v13 = vpop.xlane.xlu0 %36 }
  0xa7   :  { %v52_v14 = vsub.f32 %v48_v12, %v50_v11  ;;  %v47_v15 = vmul.f32 0.03125, %v37_v13 }
  0xa8   :  { %v45_v16 = vpop.xlane.xlu1 %44 }
  0xa9   :  { %v54_v17 = vmax.f32 %v52_v14, 0.0  ;;  %v51_v18 = vmul.f32 %v47_v15, %v47_v15  ;;  %v49_v19 = vmul.f32 0.03125, %v45_v16  ;;  %v61_v29 = vsub.f32 %v30_v1, %v47_v15 }
  0xab   :  { %v56_v20 = vadd.f32 1e-05, %v54_v17  ;;  %v53_v21 = vsub.f32 %v49_v19, %v51_v18 }
  0xad   :  { %107 = vrsqrt.f32 %v56_v20  ;;  %v55_v22 = vmax.f32 %v53_v21, 0.0 }
  0xaf   :  { %v57_v23 = vadd.f32 1e-05, %v55_v22 }
  0xb1   :  { %109 = vrsqrt.f32 %v57_v23 }
  0xb7   :  { %v108_v25 = vpop.eup %107 }
  0xb8   :  { %v62_v27 = vmul.f32 %v108_v25, %v60_v24 }
  0xba   :  { %v71_v30 = vmul.f32 %v101_v26, %v62_v27 }
  0xbb   :  { %v110_v31 = vpop.eup %109 }
  0xbc   :  { %v63_v32 = vmul.f32 %v110_v31, %v61_v29  ;;  %v80_v33 = vadd.f32 %v102_v28, %v71_v30 }
  0xbe   :  { %v72_v34 = vmul.f32 %v101_v26, %v63_v32  ;;  %82 = vst.msk [vmem:[#allocation5] sm:$0xff] %vm31_vm0, %v80_v33 }
  0xc0   :  { %v81_v35 = vadd.f32 %v102_v28, %v72_v34 }
  0xc2   :  { %83 = vst.msk [vmem:[#allocation5 + $0x8] sm:$0xff] %vm31_vm0, %v81_v35 }
  0xc3   :  { %144 = shalt.err (!%p141_p12)
}
  0xc4   :  { %s145_s5 = scalar_lea.hbm %s228_s3, 256 }
  0xc5   :  { %p146_p13 = scmp.ne.s32.totalorder %s228_s3, %s145_s5  ;;  %p149_p0 = scmp.lt.u32.totalorder %s145_s5, %s228_s3 }
  0xc7   :  { %p151_p1 = pnand %p149_p0, %p146_p13 }
  0xc9   :  { %154 = shalt.err (!%p151_p1)
}
  0xca   :  { %95 = dma.vmem_to_hbm [thread:$0]  %s90_s30, 256, %s228_s3, [#allocation4], %s160_s22, %s160_s22, %s161_s23  }
  0xcb   :  { %157 = dma.done.wait [#allocation4], 256  }
  0xcc   :  { %158 = vsyncadd [#allocation4], 4294967040 }
  0xcd   :  { %99 = vsyncpa [#allocation3], 1 }
  0xce   :  { %100 = vsyncpa [#allocation4], 1 }

</bundles_post_ra>
